<compile_context>
chip_gen: v5e
topology: v5e:2x2
jax: 0.10.0
libtpu: 0.0.40
codegen_flags: <defaults>
</compile_context>

<pallas_src>
import functools
import math

import jax
import jax.numpy as jnp
from jax.experimental import pallas as pl
from jax.experimental.pallas import tpu as pltpu

_LANE = 128


def _round_up(a, b):
    return (a + b - 1) // b * b


def _vmem_capacity_bytes():
    """Per-core VMEM capacity; conservative 64 MiB fallback (safe on all chips)."""
    try:
        info = pltpu.get_tpu_info()
        cap = getattr(info, "vmem_capacity_bytes", None)
        if cap:
            return int(cap)
    except Exception:
        pass
    return 64 * 1024 * 1024


def _pick_config(N, H, F, G, itemsize, budget):
    """Returns (tm, tk, hb, nk, g_eff, n_pad, sub).

    tm: batch tile, tk: K tile over F, hb: heads per grid block, nk: #K steps,
    g_eff: per-head output width used inside the kernel (G, lane-padded if
    needed), n_pad: padded batch extent, sub: sublane tile for this dtype.
    """
    sub = max(8, 32 // itemsize)              # 8 (f32) / 16 (bf16) / 32 (int8, fp8)
    lane = lambda c: _round_up(c, _LANE)
    w_budget = budget // 2

    # ---- contraction tile tk over F (padded accounting) ----
    g_eff = G
    per_head_w = _round_up(F, sub) * lane(G) * itemsize     # one head, full F
    if 2 * per_head_w <= w_budget:
        tk = F
    else:
        tk = None
        for cand in (2048, 1024, 512, 256, 128):
            if F % cand == 0 and 2 * _round_up(cand, sub) * lane(G) * itemsize <= w_budget:
                tk = cand
                break
        if tk is None:
            # TODO(synk): pad F when it has no lane-aligned divisor that fits VMEM.
            tk = F
        elif G % _LANE != 0 and H != 1:
            # K is tiled -> hb must be 1; pad G so the output block stays lane-dense.
            g_eff = lane(G)
    nk = F // tk

    # ---- heads per grid block (only legal when K is untiled: columns stay contiguous) ----
    if tk == F:
        hb = H                                 # block dims == full dims: always legal
        for cand in range(1, H):
            if H % cand == 0 and (cand * F) % _LANE == 0 and (cand * G) % _LANE == 0:
                hb = cand
                break
        # TODO(synk): for very large H with no 128-aligned divisor, switch the static
        # per-head unroll to a fori_loop over pl.ds slices to bound code size.
    else:
        hb = 1

    # ---- batch tile tm: the largest candidate whose padded working set fits ----
    def fits(tm_):
        x_b = 2 * _round_up(tm_, sub) * lane(hb * tk) * itemsize        # double-buffered x
        o_b = 2 * _round_up(tm_, sub) * lane(hb * g_eff) * itemsize     # double-buffered out
        w_b = 2 * hb * _round_up(tk, sub) * lane(g_eff) * itemsize      # double-buffered weight
        b_b = 2 * sub * lane(hb * g_eff) * itemsize                     # bias block
        a_b = _round_up(tm_, 8) * lane(hb * g_eff) * 4 if nk > 1 else 0 # f32 accumulator
        return x_b + o_b + w_b + b_b + a_b <= budget

    tm_max = sub
    for cand in (2048, 1024, 512, 256, 128, 64, 32, 16, 8):
        if cand % sub == 0 and fits(cand):
            tm_max = cand
            break

    n_sub = _round_up(N, sub)
    if n_sub <= tm_max:
        tm, n_pad = n_sub, n_sub
    else:
        # Prefer a tile that divides n_sub (avoids the jnp.pad copy of x), >= 256 when possible.
        tm = None
        floor = 256 if tm_max >= 256 else sub
        d = tm_max
        while d >= floor:
            if n_sub % d == 0:
                tm = d
                break
            d -= sub
        if tm is None:
            tm = tm_max
        n_pad = _round_up(n_sub, tm)

    return tm, tk, hb, nk, g_eff, n_pad, sub


def _make_kernel(*, hb, tk, g, nk, has_bias):
    def kernel(*refs):
        if has_bias:
            x_ref, w_ref, b_ref, o_ref = refs[:4]
            scratch = refs[4:]
        else:
            x_ref, w_ref, o_ref = refs[:3]
            b_ref = None
            scratch = refs[3:]

        if nk == 1:
            # Fast path: K untiled -> no accumulator scratch, direct per-head store.
            for j in range(hb):
                xj = x_ref[:, j * tk:(j + 1) * tk]
                y = jnp.dot(xj, w_ref[j], preferred_element_type=jnp.float32)
                if has_bias:
                    y = y + b_ref[:, j * g:(j + 1) * g].astype(jnp.float32)
                o_ref[:, j * g:(j + 1) * g] = y.astype(o_ref.dtype)
        else:
            acc_ref = scratch[0]
            k = pl.program_id(2)

            @pl.when(k == 0)
            def _init():
                acc_ref[...] = jnp.zeros_like(acc_ref)

            for j in range(hb):                         # hb == 1 whenever nk > 1
                xj = x_ref[:, j * tk:(j + 1) * tk]
                acc_ref[:, j * g:(j + 1) * g] += jnp.dot(
                    xj, w_ref[j], preferred_element_type=jnp.float32)

            @pl.when(k == pl.num_programs(2) - 1)
            def _finalize():
                r = acc_ref[...]
                if has_bias:
                    r = r + b_ref[...].astype(jnp.float32)
                o_ref[...] = r.astype(o_ref.dtype)

    return kernel


def linear_multihead(x, weight, bias=None, *, _budget_bytes=None):
    """einsum('nhf,hfg->nhg', x, weight) + bias (Linear_MultiHead, x.dim()==3 path).

    x: [N, H, F], weight: [H, F, G], bias: [H, G] or None. Returns [N, H, G].
    """
    # TODO(synk): x.dim()==1/2 variants of linear_multihead_op are not implemented here.
    N, H, F = x.shape
    Hw, Fw, G = weight.shape
    assert (Hw, Fw) == (H, F), "weight must be [H, F, G] matching x [N, H, F]"

    out_dtype = jnp.result_type(x.dtype, weight.dtype)
    itemsize = jnp.dtype(out_dtype).itemsize

    cap = _vmem_capacity_bytes()
    budget = _budget_bytes if _budget_bytes is not None else cap // 2
    vmem_limit = min((cap * 3) // 4, max(budget * 2, budget + 8 * 1024 * 1024))

    tm, tk, hb, nk, g_eff, n_pad, _ = _pick_config(N, H, F, G, itemsize, budget)
    has_bias = bias is not None

    # Free (contiguous) reshape — no HBM transpose of x or of the output.
    x_flat = x.reshape(N, H * F)
    if n_pad != N:
        x_flat = jnp.pad(x_flat, ((0, n_pad - N), (0, 0)))

    w = weight
    if g_eff != G:
        w = jnp.pad(weight, ((0, 0), (0, 0), (0, g_eff - G)))

    inputs = [x_flat, w]
    in_specs = [
        # x_flat [n_pad, H*F]: N-tile m, head-block h, K-tile k
        pl.BlockSpec((tm, hb * tk), lambda m, h, k: (m, h * nk + k)),
        # weight [H, F, g_eff]
        pl.BlockSpec((hb, tk, g_eff), lambda m, h, k: (h, k, 0)),
    ]
    if has_bias:
        b = bias if g_eff == G else jnp.pad(bias, ((0, 0), (0, g_eff - G)))
        inputs.append(b.reshape(1, H * g_eff))
        # lane-dense 2-D bias block, constant across m and k
        in_specs.append(pl.BlockSpec((1, hb * g_eff), lambda m, h, k: (0, h)))

    out_specs = pl.BlockSpec((tm, hb * g_eff), lambda m, h, k: (m, h))
    scratch = [pltpu.VMEM((tm, hb * g_eff), jnp.float32)] if nk > 1 else []

    kernel = _make_kernel(hb=hb, tk=tk, g=g_eff, nk=nk, has_bias=has_bias)

    out_flat = pl.pallas_call(
        kernel,
        out_shape=jax.ShapeDtypeStruct((n_pad, H * g_eff), out_dtype),
        grid_spec=pltpu.PrefetchScalarGridSpec(
            num_scalar_prefetch=0,
            grid=(n_pad // tm, H // hb, nk),
            in_specs=in_specs,
            out_specs=out_specs,
            scratch_shapes=scratch,
        ),
        compiler_params=pltpu.CompilerParams(
            dimension_semantics=("parallel", "parallel", "arbitrary"),
            vmem_limit_bytes=int(vmem_limit),
        ),
    )(*inputs)

    out = out_flat[:N] if n_pad != N else out_flat
    out = out.reshape(N, H, g_eff)
    if g_eff != G:
        out = out[..., :G]
    return out


def init_params(key, in_features, out_features, n_head_out, dtype=jnp.float32):
    """Deterministic re-implementation of Linear_MultiHead.reset_parameters."""
    kw, kb = jax.random.split(key)
    # kaiming_uniform_multihead(weight, a=sqrt(5)): bound = 1/sqrt(fan_in)
    w_bound = 1.0 / math.sqrt(in_features)
    weight = jax.random.uniform(
        kw, (n_head_out, in_features, out_features),
        minval=-w_bound, maxval=w_bound, dtype=dtype)
    b_bound = 1.0 / math.sqrt(in_features)
    bias = jax.random.uniform(
        kb, (n_head_out, out_features),
        minval=-b_bound, maxval=b_bound, dtype=dtype)
    return weight, bias


if __name__ == "__main__":
    # Case 1: small shapes matching the forward (x.dim()==3, n_head_in given).
    N, H, F, G = 2, 4, 32, 32
    key = jax.random.PRNGKey(0)
    kx, kp = jax.random.split(key)
    x = jax.random.normal(kx, (N, H, F), dtype=jnp.float32)
    weight, bias = init_params(kp, F, G, H)

    out = jax.block_until_ready(linear_multihead(x, weight, bias))
    ref = jnp.einsum("nhf,hfg->nhg", x, weight) + bias
    assert out.shape == (N, H, G)
    assert jnp.allclose(out, ref, atol=1e-5, rtol=1e-5)

    # Case 1b: no bias -> exercises the has_bias=False path (no bias alloc/DMA/add).
    out_nb = jax.block_until_ready(linear_multihead(x, weight, None))
    ref_nb = jnp.einsum("nhf,hfg->nhg", x, weight)
    assert jnp.allclose(out_nb, ref_nb, atol=1e-5, rtol=1e-5)

    # Case 2: hb == 1, lane-aligned G, nk == 1 fast path (direct store, no scratch).
    N2, H2, F2, G2 = 16, 2, 256, 128
    kx2, kp2 = jax.random.split(jax.random.PRNGKey(1))
    x2 = jax.random.normal(kx2, (N2, H2, F2), dtype=jnp.float32)
    w2, b2 = init_params(kp2, F2, G2, H2)
    out2 = jax.block_until_ready(linear_multihead(x2, w2, b2))
    ref2 = jnp.einsum("nhf,hfg->nhg", x2, w2) + b2
    assert out2.shape == (N2, H2, G2)
    assert jnp.allclose(out2, ref2, atol=2e-4, rtol=2e-4)

    # Case 3: force the K-tiled (nk > 1) accumulator path with a tiny VMEM budget.
    N3, H3, F3, G3 = 16, 2, 512, 128
    kx3, kp3 = jax.random.split(jax.random.PRNGKey(2))
    x3 = jax.random.normal(kx3, (N3, H3, F3), dtype=jnp.float32)
    w3, b3 = init_params(kp3, F3, G3, H3)
    out3 = jax.block_until_ready(
        linear_multihead(x3, w3, b3, _budget_bytes=256 * 1024))
    ref3 = jnp.einsum("nhf,hfg->nhg", x3, w3) + b3
    assert out3.shape == (N3, H3, G3)
    assert jnp.allclose(out3, ref3, atol=2e-4, rtol=2e-4)

    # Case 4: bf16 fast path — native bf16 MXU inputs with f32 accumulation.
    out_bf16 = jax.block_until_ready(
        linear_multihead(x.astype(jnp.bfloat16), weight.astype(jnp.bfloat16),
                         bias.astype(jnp.bfloat16)))
    assert out_bf16.dtype == jnp.bfloat16
    assert jnp.allclose(out_bf16.astype(jnp.float32), ref, atol=5e-2, rtol=5e-2)

    print("KERNEL_OK")
</pallas_src>

<mosaic_0001>
module attributes {stable_mosaic.version = 11 : i64} {
  func.func @kernel(%arg0: i32, %arg1: i32, %arg2: i32, %arg3: memref<8x128xf32, #tpu.memory_space<vmem>>, %arg4: memref<4x32x32xf32, #tpu.memory_space<vmem>>, %arg5: memref<1x128xf32, #tpu.memory_space<vmem>>, %arg6: memref<8x128xf32, #tpu.memory_space<vmem>>) attributes {dimension_semantics = [#tpu.dimension_semantics<parallel>, #tpu.dimension_semantics<parallel>, #tpu.dimension_semantics<arbitrary>], iteration_bounds = array<i64: 1, 1, 1>, scalar_prefetch = 0 : i64, scratch_operands = 0 : i64, tpu.core_type = #tpu.core_type<tc>, window_params = [{transform_indices = @transform_0, window_bounds = array<i64: 8, 128>}, {transform_indices = @transform_1, window_bounds = array<i64: 4, 32, 32>}, {transform_indices = @transform_2, window_bounds = array<i64: 1, 128>}, {transform_indices = @transform_3, window_bounds = array<i64: 8, 128>}]} {
    %c0 = arith.constant 0 : index
    %c0_0 = arith.constant 0 : index
    %0 = vector.load %arg3[%c0, %c0_0] : memref<8x128xf32, #tpu.memory_space<vmem>>, vector<8x32xf32>
    %c0_1 = arith.constant 0 : index
    %c0_2 = arith.constant 0 : index
    %c0_3 = arith.constant 0 : index
    %1 = vector.load %arg4[%c0_1, %c0_2, %c0_3] : memref<4x32x32xf32, #tpu.memory_space<vmem>>, vector<1x32x32xf32>
    %2 = vector.shape_cast %1 : vector<1x32x32xf32> to vector<32x32xf32>
    %cst = arith.constant dense<0.000000e+00> : vector<8x32xf32>
    %3 = tpu.matmul %0, %2, %cst {dimension_numbers = #tpu.dot_dimension_numbers<[1], [0], [0], [1], [0, 0, 1, 1], [], []>} : vector<8x32xf32>, vector<32x32xf32>, vector<8x32xf32> -> vector<8x32xf32>
    %c0_4 = arith.constant 0 : index
    %c0_5 = arith.constant 0 : index
    %4 = vector.load %arg5[%c0_4, %c0_5] : memref<1x128xf32, #tpu.memory_space<vmem>>, vector<1x32xf32>
    %5 = vector.broadcast %4 : vector<1x32xf32> to vector<8x32xf32>
    %6 = arith.addf %3, %5 : vector<8x32xf32>
    %c0_6 = arith.constant 0 : index
    %c0_7 = arith.constant 0 : index
    %7 = vector.load %arg6[%c0_6, %c0_7] : memref<8x128xf32, #tpu.memory_space<vmem>>, vector<8x32xf32>
    tpu.vector_store %arg6[%c0_6, %c0_7], %6 {strides = array<i32>} : memref<8x128xf32, #tpu.memory_space<vmem>>, vector<8x32xf32>,
    %c0_8 = arith.constant 0 : index
    %c32 = arith.constant 32 : index
    %8 = vector.load %arg3[%c0_8, %c32] : memref<8x128xf32, #tpu.memory_space<vmem>>, vector<8x32xf32>
    %c1 = arith.constant 1 : index
    %c0_9 = arith.constant 0 : index
    %c0_10 = arith.constant 0 : index
    %9 = vector.load %arg4[%c1, %c0_9, %c0_10] : memref<4x32x32xf32, #tpu.memory_space<vmem>>, vector<1x32x32xf32>
    %10 = vector.shape_cast %9 : vector<1x32x32xf32> to vector<32x32xf32>
    %cst_11 = arith.constant dense<0.000000e+00> : vector<8x32xf32>
    %11 = tpu.matmul %8, %10, %cst_11 {dimension_numbers = #tpu.dot_dimension_numbers<[1], [0], [0], [1], [0, 0, 1, 1], [], []>} : vector<8x32xf32>, vector<32x32xf32>, vector<8x32xf32> -> vector<8x32xf32>
    %c0_12 = arith.constant 0 : index
    %c32_13 = arith.constant 32 : index
    %12 = vector.load %arg5[%c0_12, %c32_13] : memref<1x128xf32, #tpu.memory_space<vmem>>, vector<1x32xf32>
    %13 = vector.broadcast %12 : vector<1x32xf32> to vector<8x32xf32>
    %14 = arith.addf %11, %13 : vector<8x32xf32>
    %c0_14 = arith.constant 0 : index
    %c32_15 = arith.constant 32 : index
    %15 = vector.load %arg6[%c0_14, %c32_15] : memref<8x128xf32, #tpu.memory_space<vmem>>, vector<8x32xf32>
    tpu.vector_store %arg6[%c0_14, %c32_15], %14 {strides = array<i32>} : memref<8x128xf32, #tpu.memory_space<vmem>>, vector<8x32xf32>,
    %c0_16 = arith.constant 0 : index
    %c64 = arith.constant 64 : index
    %16 = vector.load %arg3[%c0_16, %c64] : memref<8x128xf32, #tpu.memory_space<vmem>>, vector<8x32xf32>
    %c2 = arith.constant 2 : index
    %c0_17 = arith.constant 0 : index
    %c0_18 = arith.constant 0 : index
    %17 = vector.load %arg4[%c2, %c0_17, %c0_18] : memref<4x32x32xf32, #tpu.memory_space<vmem>>, vector<1x32x32xf32>
    %18 = vector.shape_cast %17 : vector<1x32x32xf32> to vector<32x32xf32>
    %cst_19 = arith.constant dense<0.000000e+00> : vector<8x32xf32>
    %19 = tpu.matmul %16, %18, %cst_19 {dimension_numbers = #tpu.dot_dimension_numbers<[1], [0], [0], [1], [0, 0, 1, 1], [], []>} : vector<8x32xf32>, vector<32x32xf32>, vector<8x32xf32> -> vector<8x32xf32>
    %c0_20 = arith.constant 0 : index
    %c64_21 = arith.constant 64 : index
    %20 = vector.load %arg5[%c0_20, %c64_21] : memref<1x128xf32, #tpu.memory_space<vmem>>, vector<1x32xf32>
    %21 = vector.broadcast %20 : vector<1x32xf32> to vector<8x32xf32>
    %22 = arith.addf %19, %21 : vector<8x32xf32>
    %c0_22 = arith.constant 0 : index
    %c64_23 = arith.constant 64 : index
    %23 = vector.load %arg6[%c0_22, %c64_23] : memref<8x128xf32, #tpu.memory_space<vmem>>, vector<8x32xf32>
    tpu.vector_store %arg6[%c0_22, %c64_23], %22 {strides = array<i32>} : memref<8x128xf32, #tpu.memory_space<vmem>>, vector<8x32xf32>,
    %c0_24 = arith.constant 0 : index
    %c96 = arith.constant 96 : index
    %24 = vector.load %arg3[%c0_24, %c96] : memref<8x128xf32, #tpu.memory_space<vmem>>, vector<8x32xf32>
    %c3 = arith.constant 3 : index
    %c0_25 = arith.constant 0 : index
    %c0_26 = arith.constant 0 : index
    %25 = vector.load %arg4[%c3, %c0_25, %c0_26] : memref<4x32x32xf32, #tpu.memory_space<vmem>>, vector<1x32x32xf32>
    %26 = vector.shape_cast %25 : vector<1x32x32xf32> to vector<32x32xf32>
    %cst_27 = arith.constant dense<0.000000e+00> : vector<8x32xf32>
    %27 = tpu.matmul %24, %26, %cst_27 {dimension_numbers = #tpu.dot_dimension_numbers<[1], [0], [0], [1], [0, 0, 1, 1], [], []>} : vector<8x32xf32>, vector<32x32xf32>, vector<8x32xf32> -> vector<8x32xf32>
    %c0_28 = arith.constant 0 : index
    %c96_29 = arith.constant 96 : index
    %28 = vector.load %arg5[%c0_28, %c96_29] : memref<1x128xf32, #tpu.memory_space<vmem>>, vector<1x32xf32>
    %29 = vector.broadcast %28 : vector<1x32xf32> to vector<8x32xf32>
    %30 = arith.addf %27, %29 : vector<8x32xf32>
    %c0_30 = arith.constant 0 : index
    %c96_31 = arith.constant 96 : index
    %31 = vector.load %arg6[%c0_30, %c96_31] : memref<8x128xf32, #tpu.memory_space<vmem>>, vector<8x32xf32>
    tpu.vector_store %arg6[%c0_30, %c96_31], %30 {strides = array<i32>} : memref<8x128xf32, #tpu.memory_space<vmem>>, vector<8x32xf32>,
    return
  }
  func.func @transform_0(%arg0: i32, %arg1: i32, %arg2: i32) -> (i32, i32) {
    %c1_i32 = arith.constant 1 : i32
    %0 = arith.muli %arg1, %c1_i32 : i32
    %1 = arith.addi %0, %arg2 : i32
    %c0_i32 = arith.constant 0 : i32
    return %arg0, %1 : i32, i32
  }
  func.func @transform_1(%arg0: i32, %arg1: i32, %arg2: i32) -> (i32, i32, i32) {
    %c0_i32 = arith.constant 0 : i32
    %c0_i32_0 = arith.constant 0 : i32
    return %arg1, %arg2, %c0_i32 : i32, i32, i32
  }
  func.func @transform_2(%arg0: i32, %arg1: i32, %arg2: i32) -> (i32, i32) {
    %c0_i32 = arith.constant 0 : i32
    %c0_i32_0 = arith.constant 0 : i32
    return %c0_i32, %arg1 : i32, i32
  }
  func.func @transform_3(%arg0: i32, %arg1: i32, %arg2: i32) -> (i32, i32) {
    %c0_i32 = arith.constant 0 : i32
    return %arg0, %arg1 : i32, i32
  }
}

</mosaic_0001>

<bundles_post_ra>
// kernel: tpu_custom_call.1
= control target key start
LH: loop header
LB: loop body
LE: loop exit
PB: predicated region body
PF: predicated region fallthrough
CT: control target
= control target key end

     0   :  { %8 = vsyncpa [#allocation3], 0  ;;  %s382_s0 = inlined_call_operand.hbm [shape: f32[8,128], index: 0, kind: input, shape index: {}]   ;;  %s383_s1 = inlined_call_operand.hbm [shape: f32[4,32,32], index: 1, kind: input, shape index: {}]   ;;  %s384_s2 = inlined_call_operand.vmem [shape: f32[1,128], index: 2, kind: input, shape index: {}]   ;;  %s385_s3 = inlined_call_operand.hbm [shape: f32[8,128], index: 3, kind: output, shape index: {}]  }
   0x1   :  { %9 = vsyncpa [#allocation6], 0 }
   0x2   :  { %10 = vsyncpa [#allocation4], 0  ;;  %s19_s14 = sshll.u32 %s382_s0, 4  ;;  %s324_s15 = smov [#allocation2]   ;;  %s20_s14 = int_to_ptr.hbm [resolvable:$true] %s19_s14 }
   0x3   :  { %s21_s16 = sshll.u32 %s324_s15, 4  ;;  %s29_s19 = sshll.u32 %s383_s1, 4  ;;  %s22_s16 = int_to_ptr.vmem [resolvable:$true] %s21_s16  ;;  %s30_s19 = int_to_ptr.hbm [resolvable:$true] %s29_s19 }
   0x4   :  { %24 = dma.hbm_to_vmem [thread:$0]  %s20_s14, 128, %s22_s16, [#allocation3]  }
   0x5   :  { %s325_s20 = smov [#allocation5]   ;;  %s326_s22 = smov 128  }
   0x6   :  { %s31_s21 = sshll.u32 %s325_s20, 4  ;;  %s327_s23 = smov 8   ;;  %s32_s21 = int_to_ptr.vmem [resolvable:$true] %s31_s21 }
   0x7   :  { %37 = dma.hbm_to_vmem [thread:$0]  %s30_s19, 2048, %s32_s21, [#allocation6], %s326_s22, %s326_s22, %s327_s23  }
   0x8   :  { %318 = dma.done.wait [#allocation3], 128  }
   0x9   :  { %319 = vsyncadd [#allocation3], 4294967168 }
   0xa   :  { %320 = dma.done.wait [#allocation6], 2048  }
   0xb   :  { %321 = vsyncadd [#allocation6], 4294965248  ;;  %v126_v0 = vld [vmem:[#allocation2] sm:$0xff]  ;;  %s328_s0 = smov 64   ;;  %s329_s24 = smov 96   ;;  %v130_v2 = vld [vmem:[#allocation5 + $0x50] sm:$0xff] }
   0xc   :  { %v131_v1 = vld [vmem:[#allocation5 + $0x58] sm:$0xff]  ;;  %136 = vrot.lane.b32.xlu0 %v126_v0, %s328_s0  ;;  %93 = vrot.lane.b32.xlu1 %v126_v0, %s329_s24  ;;  %v129_v4 = vld [vmem:[#allocation5 + $0x48] sm:$0xff]  ;;  %v128_v5 = vld [vmem:[#allocation5 + $0x40] sm:$0xff]  ;;  %s330_s1 = smov 32   ;;  %vm58_vm0 = vcmask 261120   ;;  %vm124_vm1 = vcmask 523520  }
   0xd   :  { %v88_v3 = vld [vmem:[#allocation5 + $0x38] sm:$0xff]  ;;  %155 = vmatpush.msra.mxu2 %v131_v1  ;;  %v87_v6 = vld [vmem:[#allocation5 + $0x30] sm:$0xff]  ;;  %v86_v7 = vld [vmem:[#allocation5 + $0x28] sm:$0xff]  ;;  %s219_s9 = sshll.u32 %s385_s3, 4  ;;  %vm167_vm2 = vcmask 785920   ;;  %vm210_vm3 = vcmask 1048320   ;;  %s220_s9 = int_to_ptr.hbm [resolvable:$true] %s219_s9 }
   0xe   :  { %112 = vmatpush.msra.mxu1 %v88_v3  ;;  %v242_v8 = vld [vmem:[%s384_s2] ss:$0 sm:$0xff]  ;;  %v85_v9 = vld [vmem:[#allocation5 + $0x20] sm:$0xff]  ;;  %v173_v11 = vld [vmem:[#allocation5 + $0x70] sm:$0xff] }
   0xf   :  { %156 = vmatpush.msra.mxu2 %v130_v2  ;;  %v174_v10 = vld [vmem:[#allocation5 + $0x78] sm:$0xff]  ;;  %v172_v12 = vld [vmem:[#allocation5 + $0x68] sm:$0xff]  ;;  %v171_v13 = vld [vmem:[#allocation5 + $0x60] sm:$0xff] }
  0x10   :  { %113 = vmatpush.msra.mxu1 %v87_v6  ;;  %198 = vmatpush.msra.mxu3 %v174_v10  ;;  %v243_v14 = vld [vmem:[%s384_s2] ss:$0 sm:$0xff]  ;;  %v52_v16 = vld [vmem:[#allocation5 + $0x10] sm:$0xff]  ;;  %v51_v17 = vld [vmem:[#allocation5 + $0x8] sm:$0xff] }
  0x11   :  { %157 = vmatpush.msra.mxu2 %v129_v4  ;;  %v53_v15 = vld [vmem:[#allocation5 + $0x18] sm:$0xff]  ;;  %138 = vrot.lane.b32.xlu2 %v243_v14, %s328_s0  ;;  %v50_v18 = vld [vmem:[#allocation5] sm:$0xff] }
  0x12   :  { %114 = vmatpush.msra.mxu1 %v86_v7  ;;  %199 = vmatpush.msra.mxu3 %v173_v11  ;;  %v244_v19 = vld [vmem:[%s384_s2] ss:$0 sm:$0xff] }
  0x13   :  { %158 = vmatpush.msra.mxu2 %v128_v5  ;;  %74 = vmatpush.msra.mxu0 %v53_v15  ;;  %v245_v23 = vld [vmem:[%s384_s2] ss:$0 sm:$0xff]  ;;  %s331_s2 = smov [#allocation7]  }
  0x14   :  { %179 = vrot.lane.b32.xlu0 %v126_v0, %s330_s1  ;;  %95 = vrot.lane.b32.xlu1 %v242_v8, %s329_s24  ;;  %s217_s6 = sshll.u32 %s331_s2, 4  ;;  %s218_s6 = int_to_ptr.vmem [resolvable:$true] %s217_s6 }
  0x15   :  { %115 = vmatpush.msra.mxu1 %v85_v9  ;;  %200 = vmatpush.msra.mxu3 %v172_v12 }
  0x16   :  { %75 = vmatpush.msra.mxu0 %v52_v16 }
  0x17   :  { %201 = vmatpush.msra.mxu3 %v171_v13 }
  0x18   :  { %76 = vmatpush.msra.mxu0 %v51_v17 }
  0x19   :  { %181 = vrot.lane.b32.xlu2 %v244_v19, %s330_s1 }
  0x1a   :  { %77 = vmatpush.msra.mxu0 %v50_v18 }
  0x1b   :  { %230 = vmatmul.msk.f32.vlgmr.msra.gmra.mxu0 %vm58_vm0, %v126_v0 }
  0x6b   :  { %v139_v29 = vpop.permute.xlu2 %138 }
  0x73   :  { %v182_v32 = vpop.permute.xlu2 %181 }
  0x7e   :  { %v137_v20 = vpop.permute.xlu0 %136  ;;  %v94_v21 = vpop.permute.xlu1 %93 }
  0x7f   :  { %232 = vmatmul.msk.f32.vlgmr.msra.gmra.mxu2 %vm58_vm0, %v137_v20  ;;  %231 = vmatmul.msk.f32.vlgmr.msra.gmra.mxu1 %vm58_vm0, %v94_v21 }
  0x86   :  { %v180_v22 = vpop.permute.xlu0 %179  ;;  %v96_v26 = vpop.permute.xlu1 %95 }
  0x87   :  { %233 = vmatmul.msk.f32.vlgmr.msra.gmra.mxu3 %vm58_vm0, %v180_v22 }
  0x98   :  { %v79_v24 = vpop.f32.mrf.mxu0 }
  0x99   :  { %v80_v25 = vadd.f32 %v245_v23, %v79_v24 }
  0x9b   :  { %82 = vst.msk [vmem:[#allocation7] sm:$0xff] %vm58_vm0, %v80_v25 }
  0xfc   :  { %v117_v27 = vpop.f32.mrf.mxu1 }
  0xfd   :  { %v118_v28 = vadd.f32 %v117_v27, %v96_v26 }
  0xff   :  { %121 = vrot.lane.b32.xlu0 %v118_v28, %s330_s1 }
 0x102   :  { %v160_v30 = vpop.f32.mrf.mxu2 }
 0x103   :  { %v161_v31 = vadd.f32 %v160_v30, %v139_v29 }
 0x105   :  { %164 = vrot.lane.b32.xlu1 %v161_v31, %s328_s0 }
 0x10a   :  { %v203_v33 = vpop.f32.mrf.mxu3 }
 0x10b   :  { %v204_v34 = vadd.f32 %v203_v33, %v182_v32 }
 0x10d   :  { %207 = vrot.lane.b32.xlu2 %v204_v34, %s329_s24 }
 0x167   :  { %v208_v36 = vpop.permute.xlu2 %207 }
 0x171   :  { %v122_v35 = vpop.permute.xlu0 %121 }
 0x172   :  { %125 = vst.msk [vmem:[#allocation7] sm:$0xff] %vm124_vm1, %v122_v35 }
 0x177   :  { %v165_v37 = vpop.permute.xlu1 %164 }
 0x178   :  { %168 = vst.msk [vmem:[#allocation7] sm:$0xff] %vm167_vm2, %v165_v37 }
 0x179   :  { %211 = vst.msk [vmem:[#allocation7] sm:$0xff] %vm210_vm3, %v208_v36 }
 0x17a   :  { %222 = dma.vmem_to_hbm [thread:$0]  %s218_s6, 128, %s220_s9, [#allocation4]  }
 0x17b   :  { %322 = dma.done.wait [#allocation4], 128  }
 0x17c   :  { %323 = vsyncadd [#allocation4], 4294967168 }
 0x17d   :  { %227 = vsyncpa [#allocation3], 1 }
 0x17e   :  { %228 = vsyncpa [#allocation6], 1 }
 0x17f   :  { %229 = vsyncpa [#allocation4], 1 }

</bundles_post_ra>
